<compile_context>
chip_gen: v5e
topology: v5e:2x2
jax: 0.10.0
libtpu: 0.0.40
codegen_flags: <defaults>
</compile_context>

<pallas_src>
import math

import jax
import jax.numpy as jnp
from jax.experimental import pallas as pl
from jax.experimental.pallas import tpu as pltpu


_SQRT_2_OVER_PI = math.sqrt(2.0 / math.pi)
_GELU_COEF = 0.044715


def _gelu_tanh(x):
    # 0.5 * x * (1 + tanh(sqrt(2/pi) * (x + 0.044715 * x^3)))
    return 0.5 * x * (1.0 + jnp.tanh(_SQRT_2_OVER_PI * (x + _GELU_COEF * x * x * x)))


# ---------------------------- kernels ----------------------------

def _ffn_single_kernel(x_ref, w1_ref, b1_ref, w2_ref, b2_ref, o_ref):
    """Single pass over the whole hidden dim; weights resident in VMEM."""
    h = jnp.dot(x_ref[...], w1_ref[...], preferred_element_type=jnp.float32)
    g = _gelu_tanh(h + b1_ref[...].astype(jnp.float32))
    y = jnp.dot(g.astype(w2_ref.dtype), w2_ref[...],
                preferred_element_type=jnp.float32)
    o_ref[...] = (y + b2_ref[...].astype(jnp.float32)).astype(o_ref.dtype)


def _ffn_reduce_kernel_f32out(x_ref, w1_ref, b1_ref, w2_ref, b2_ref, o_ref):
    """Hidden-dim reduction, f32 output: accumulate directly into o_ref."""
    h_idx = pl.program_id(1)
    th = w1_ref.shape[1]

    @pl.when(h_idx == 0)
    def _():
        o_ref[...] = jnp.broadcast_to(b2_ref[...].astype(o_ref.dtype), o_ref.shape)

    start = pl.multiple_of(h_idx * th, 128)
    b1_tile = b1_ref[:, pl.ds(start, th)].astype(jnp.float32)
    h = jnp.dot(x_ref[...], w1_ref[...], preferred_element_type=jnp.float32)
    g = _gelu_tanh(h + b1_tile)
    o_ref[...] += jnp.dot(g.astype(w2_ref.dtype), w2_ref[...],
                          preferred_element_type=jnp.float32)


def _ffn_reduce_kernel_acc(x_ref, w1_ref, b1_ref, w2_ref, b2_ref, o_ref, acc_ref):
    """Hidden-dim reduction, non-f32 output: f32 VMEM accumulator scratch."""
    h_idx = pl.program_id(1)
    th = w1_ref.shape[1]

    @pl.when(h_idx == 0)
    def _():
        acc_ref[...] = jnp.zeros_like(acc_ref)

    start = pl.multiple_of(h_idx * th, 128)
    b1_tile = b1_ref[:, pl.ds(start, th)].astype(jnp.float32)
    h = jnp.dot(x_ref[...], w1_ref[...], preferred_element_type=jnp.float32)
    g = _gelu_tanh(h + b1_tile)
    acc_ref[...] += jnp.dot(g.astype(w2_ref.dtype), w2_ref[...],
                            preferred_element_type=jnp.float32)

    @pl.when(h_idx == pl.num_programs(1) - 1)
    def _():
        o_ref[...] = (acc_ref[...] + b2_ref[...].astype(jnp.float32)).astype(o_ref.dtype)


# ------------------------ tiling heuristics ------------------------

def _round_up(v, m):
    return ((v + m - 1) // m) * m


def _fp_single(tm, d, hidden, itemsize):
    act = 2 * 2 * tm * d * itemsize              # x + out tiles, double-buffered
    weights = 2 * 2 * d * hidden * itemsize      # W1 + W2 resident (count 2x, conservative)
    biases = 2 * (hidden + d) * itemsize
    inter = tm * hidden * (4 + itemsize)         # f32 hidden activations + matmul-2 operand
    return act + weights + biases + inter


def _fp_reduce(tm, th, d, hidden, itemsize):
    act = 2 * 2 * tm * d * itemsize
    wblocks = 2 * 2 * d * th * itemsize          # W1/W2 hidden tiles, double-buffered
    biases = 2 * (hidden + d) * itemsize         # b1 resident full, b2 tiny
    acc = tm * d * 4                             # f32 accumulator (worst case)
    inter = tm * th * (4 + itemsize)
    return act + wblocks + biases + acc + inter


def _select_tiles(rows, d, hidden, itemsize, budget, block_rows):
    """Returns (tm, th, single_pass).  The row tile is grown FIRST (it is the
    only knob that reduces weight re-streaming); the hidden tile second."""
    cap = min(block_rows, max(8, _round_up(rows, 8)))

    def grow_tm(fp_fn):
        if fp_fn(8) > budget:
            return None
        tm = 8
        while tm * 2 <= cap and fp_fn(tm * 2) <= budget:
            tm *= 2
        return tm

    # Mode A: single pass, weights fully resident.
    tm = grow_tm(lambda t: _fp_single(t, d, hidden, itemsize))
    if tm is not None:
        return tm, hidden, True

    # Mode B: hidden-dim reduction.  Keep th moderate (vreg/VMEM pressure);
    # pick the combo with the largest tm, tie-break on larger th.
    best = None
    for th in (512, 256, 128):
        if th >= hidden or hidden % th != 0:
            continue
        t = grow_tm(lambda t, th=th: _fp_reduce(t, th, d, hidden, itemsize))
        if t is None:
            continue
        if best is None or (t, th) > best:
            best = (t, th)
    if best is not None:
        return best[0], best[1], False

    # Fallback (pathological dims): single pass at minimum row tile;
    # vmem_limit below is raised to cover it.
    return 8, hidden, True


# ---------------------------- wrapper ----------------------------

def feed_forward(x, w1, b1, w2, b2, *, block_rows=1024, matmul_dtype=None):
    """y = gelu_tanh(x @ w1 + b1) @ w2 + b2.  x: (..., D); w1: (D, H); w2: (H, D)."""
    orig_shape = x.shape
    out_dtype = x.dtype
    d = orig_shape[-1]
    hidden = w1.shape[1]
    assert w1.shape == (d, hidden) and b1.shape == (hidden,)
    assert w2.shape == (hidden, d) and b2.shape == (d,)

    if matmul_dtype is not None:     # optional bf16 MXU inputs on v6e/v7x
        x = x.astype(matmul_dtype)
        w1 = w1.astype(matmul_dtype)
        w2 = w2.astype(matmul_dtype)

    rows = 1
    for s in orig_shape[:-1]:
        rows *= s
    x2 = x.reshape(rows, d)
    itemsize = x2.dtype.itemsize

    # Generation-aware VMEM budget.
    try:
        vmem_physical = int(pltpu.get_tpu_info().vmem_capacity_bytes)
    except Exception:
        vmem_physical = 64 << 20     # conservative (v7x per-TensorCore)
    budget = min((vmem_physical * 3) // 4, 100 << 20)

    tm, th, single_pass = _select_tiles(rows, d, hidden, itemsize, budget, block_rows)

    # Balance row tiles to minimize padding; make sure the "parallel" row axis
    # has >= 2 tiles when there is enough work (v7x megacore).
    num_row_tiles = pl.cdiv(rows, tm)
    if num_row_tiles == 1 and rows >= 512:
        num_row_tiles = 2
    tm = min(tm, _round_up(pl.cdiv(rows, num_row_tiles), 8))
    padded_rows = num_row_tiles * tm
    if padded_rows != rows:
        x2 = jnp.pad(x2, ((0, padded_rows - rows), (0, 0)))

    b1_2 = b1.reshape(1, hidden)
    b2_2 = b2.reshape(1, d)

    fp = (_fp_single(tm, d, hidden, itemsize) if single_pass
          else _fp_reduce(tm, th, d, hidden, itemsize))
    vmem_limit = int(min(vmem_physical * 0.9,
                         max(fp * 1.4 + (2 << 20), 32 << 20)))

    # Cost estimate reflecting actual weight (re-)streaming.
    weight_bytes = 2 * d * hidden * itemsize
    weight_passes = 1 if single_pass else num_row_tiles
    cost = pl.CostEstimate(
        flops=4 * rows * d * hidden,
        transcendentals=rows * hidden,
        bytes_accessed=(2 * rows * d + hidden + d) * itemsize
        + weight_passes * weight_bytes,
    )

    if single_pass:
        grid = (num_row_tiles,)
        in_specs = [
            pl.BlockSpec((tm, d), lambda i: (i, 0)),           # x row tile
            pl.BlockSpec((d, hidden), lambda i: (0, 0)),       # W1 resident
            pl.BlockSpec((1, hidden), lambda i: (0, 0)),       # b1 resident
            pl.BlockSpec((hidden, d), lambda i: (0, 0)),       # W2 resident
            pl.BlockSpec((1, d), lambda i: (0, 0)),            # b2 resident
        ]
        out_specs = pl.BlockSpec((tm, d), lambda i: (i, 0))
        scratch_shapes = []
        kernel = _ffn_single_kernel
        semantics = ("parallel",)
    else:
        num_h_tiles = hidden // th
        grid = (num_row_tiles, num_h_tiles)                    # reduction axis last
        in_specs = [
            pl.BlockSpec((tm, d), lambda i, h: (i, 0)),        # x row tile
            pl.BlockSpec((d, th), lambda i, h: (0, h)),        # W1 column tile
            pl.BlockSpec((1, hidden), lambda i, h: (0, 0)),    # b1 resident (sliced in-kernel)
            pl.BlockSpec((th, d), lambda i, h: (h, 0)),        # W2 row tile
            pl.BlockSpec((1, d), lambda i, h: (0, 0)),         # b2 resident
        ]
        out_specs = pl.BlockSpec((tm, d), lambda i, h: (i, 0))
        if out_dtype == jnp.float32:
            scratch_shapes = []
            kernel = _ffn_reduce_kernel_f32out
        else:
            scratch_shapes = [pltpu.VMEM((tm, d), jnp.float32)]
            kernel = _ffn_reduce_kernel_acc
        semantics = ("parallel", "arbitrary")

    out = pl.pallas_call(
        kernel,
        out_shape=jax.ShapeDtypeStruct((padded_rows, d), out_dtype),
        grid_spec=pltpu.PrefetchScalarGridSpec(
            num_scalar_prefetch=0,
            grid=grid,
            in_specs=in_specs,
            out_specs=out_specs,
            scratch_shapes=scratch_shapes,
        ),
        compiler_params=pltpu.CompilerParams(
            dimension_semantics=semantics,
            vmem_limit_bytes=vmem_limit,
        ),
        cost_estimate=cost,
    )(x2, w1, b1_2, w2, b2_2)

    if padded_rows != rows:
        out = out[:rows]
    return out.reshape(orig_shape)


if __name__ == "__main__":
    key = jax.random.PRNGKey(0)
    batch, seq, emb_dim = 2, 8, 32
    hidden = 4 * emb_dim

    k_x, k_w1, k_b1, k_w2, k_b2 = jax.random.split(key, 5)
    x = jax.random.normal(k_x, (batch, seq, emb_dim), dtype=jnp.float32)
    w1 = 0.02 * jax.random.normal(k_w1, (emb_dim, hidden), dtype=jnp.float32)
    b1 = 0.01 * jax.random.normal(k_b1, (hidden,), dtype=jnp.float32)
    w2 = 0.02 * jax.random.normal(k_w2, (hidden, emb_dim), dtype=jnp.float32)
    b2 = 0.01 * jax.random.normal(k_b2, (emb_dim,), dtype=jnp.float32)

    out = feed_forward(x, w1, b1, w2, b2)
    out = jax.block_until_ready(out)

    # Pure-JAX reference (same tanh-GELU formula as the PyTorch module).
    hp = jnp.dot(x, w1, precision=jax.lax.Precision.HIGHEST) + b1
    gp = 0.5 * hp * (1.0 + jnp.tanh(_SQRT_2_OVER_PI * (hp + _GELU_COEF * hp ** 3)))
    ref = jnp.dot(gp, w2, precision=jax.lax.Precision.HIGHEST) + b2

    assert out.shape == x.shape
    assert out.dtype == x.dtype
    max_err = float(jnp.max(jnp.abs(out - ref)))
    assert max_err < 5e-4, max_err
    print("KERNEL_OK")
</pallas_src>

<mosaic_0001>
module attributes {stable_mosaic.version = 11 : i64} {
  func.func @_ffn_single_kernel(%arg0: i32, %arg1: memref<16x32xf32, #tpu.memory_space<vmem>>, %arg2: memref<32x128xf32, #tpu.memory_space<vmem>>, %arg3: memref<1x128xf32, #tpu.memory_space<vmem>>, %arg4: memref<128x32xf32, #tpu.memory_space<vmem>>, %arg5: memref<1x32xf32, #tpu.memory_space<vmem>>, %arg6: memref<16x32xf32, #tpu.memory_space<vmem>>) attributes {dimension_semantics = [#tpu.dimension_semantics<parallel>], iteration_bounds = array<i64: 1>, scalar_prefetch = 0 : i64, scratch_operands = 0 : i64, tpu.core_type = #tpu.core_type<tc>, window_params = [{transform_indices = @transform_0, window_bounds = array<i64: 16, 32>}, {pipeline_mode = #tpu.pipeline_mode<synchronous>, transform_indices = @transform_1, window_bounds = array<i64: 32, 128>}, {pipeline_mode = #tpu.pipeline_mode<synchronous>, transform_indices = @transform_2, window_bounds = array<i64: 1, 128>}, {pipeline_mode = #tpu.pipeline_mode<synchronous>, transform_indices = @transform_3, window_bounds = array<i64: 128, 32>}, {pipeline_mode = #tpu.pipeline_mode<synchronous>, transform_indices = @transform_4, window_bounds = array<i64: 1, 32>}, {transform_indices = @transform_5, window_bounds = array<i64: 16, 32>}]} {
    %c0 = arith.constant 0 : index
    %c0_0 = arith.constant 0 : index
    %0 = vector.load %arg1[%c0, %c0_0] : memref<16x32xf32, #tpu.memory_space<vmem>>, vector<16x32xf32>
    %c0_1 = arith.constant 0 : index
    %c0_2 = arith.constant 0 : index
    %1 = vector.load %arg2[%c0_1, %c0_2] : memref<32x128xf32, #tpu.memory_space<vmem>>, vector<32x128xf32>
    %cst = arith.constant dense<0.000000e+00> : vector<16x128xf32>
    %2 = tpu.matmul %0, %1, %cst {dimension_numbers = #tpu.dot_dimension_numbers<[1], [0], [0], [1], [0, 0, 1, 1], [], []>} : vector<16x32xf32>, vector<32x128xf32>, vector<16x128xf32> -> vector<16x128xf32>
    %c0_3 = arith.constant 0 : index
    %c0_4 = arith.constant 0 : index
    %3 = vector.load %arg3[%c0_3, %c0_4] : memref<1x128xf32, #tpu.memory_space<vmem>>, vector<1x128xf32>
    %4 = vector.broadcast %3 : vector<1x128xf32> to vector<16x128xf32>
    %5 = arith.addf %2, %4 : vector<16x128xf32>
    %cst_5 = arith.constant 5.000000e-01 : f32
    %6 = vector.broadcast %cst_5 : f32 to vector<16x128xf32>
    %7 = arith.mulf %6, %5 : vector<16x128xf32>
    %cst_6 = arith.constant 4.471500e-02 : f32
    %8 = vector.broadcast %cst_6 : f32 to vector<16x128xf32>
    %9 = arith.mulf %8, %5 : vector<16x128xf32>
    %10 = arith.mulf %9, %5 : vector<16x128xf32>
    %11 = arith.mulf %10, %5 : vector<16x128xf32>
    %12 = arith.addf %5, %11 : vector<16x128xf32>
    %cst_7 = arith.constant 0.797884583 : f32
    %13 = vector.broadcast %cst_7 : f32 to vector<16x128xf32>
    %14 = arith.mulf %13, %12 : vector<16x128xf32>
    %15 = math.tanh %14 : vector<16x128xf32>
    %cst_8 = arith.constant 1.000000e+00 : f32
    %16 = vector.broadcast %cst_8 : f32 to vector<16x128xf32>
    %17 = arith.addf %16, %15 : vector<16x128xf32>
    %18 = arith.mulf %7, %17 : vector<16x128xf32>
    %c0_9 = arith.constant 0 : index
    %c0_10 = arith.constant 0 : index
    %19 = vector.load %arg4[%c0_9, %c0_10] : memref<128x32xf32, #tpu.memory_space<vmem>>, vector<128x32xf32>
    %cst_11 = arith.constant dense<0.000000e+00> : vector<16x32xf32>
    %20 = tpu.matmul %18, %19, %cst_11 {dimension_numbers = #tpu.dot_dimension_numbers<[1], [0], [0], [1], [0, 0, 1, 1], [], []>} : vector<16x128xf32>, vector<128x32xf32>, vector<16x32xf32> -> vector<16x32xf32>
    %c0_12 = arith.constant 0 : index
    %c0_13 = arith.constant 0 : index
    %21 = vector.load %arg5[%c0_12, %c0_13] : memref<1x32xf32, #tpu.memory_space<vmem>>, vector<1x32xf32>
    %22 = vector.broadcast %21 : vector<1x32xf32> to vector<16x32xf32>
    %23 = arith.addf %20, %22 : vector<16x32xf32>
    %c0_14 = arith.constant 0 : index
    %c0_15 = arith.constant 0 : index
    %24 = vector.load %arg6[%c0_14, %c0_15] : memref<16x32xf32, #tpu.memory_space<vmem>>, vector<16x32xf32>
    tpu.vector_store %arg6[%c0_14, %c0_15], %23 {strides = array<i32>} : memref<16x32xf32, #tpu.memory_space<vmem>>, vector<16x32xf32>,
    return
  }
  func.func @transform_0(%arg0: i32) -> (i32, i32) {
    %c0_i32 = arith.constant 0 : i32
    %c0_i32_0 = arith.constant 0 : i32
    return %arg0, %c0_i32 : i32, i32
  }
  func.func @transform_1(%arg0: i32) -> (i32, i32) {
    %c0_i32 = arith.constant 0 : i32
    %c0_i32_0 = arith.constant 0 : i32
    %c0_i32_1 = arith.constant 0 : i32
    return %c0_i32, %c0_i32_0 : i32, i32
  }
  func.func @transform_2(%arg0: i32) -> (i32, i32) {
    %c0_i32 = arith.constant 0 : i32
    %c0_i32_0 = arith.constant 0 : i32
    %c0_i32_1 = arith.constant 0 : i32
    return %c0_i32, %c0_i32_0 : i32, i32
  }
  func.func @transform_3(%arg0: i32) -> (i32, i32) {
    %c0_i32 = arith.constant 0 : i32
    %c0_i32_0 = arith.constant 0 : i32
    %c0_i32_1 = arith.constant 0 : i32
    return %c0_i32, %c0_i32_0 : i32, i32
  }
  func.func @transform_4(%arg0: i32) -> (i32, i32) {
    %c0_i32 = arith.constant 0 : i32
    %c0_i32_0 = arith.constant 0 : i32
    %c0_i32_1 = arith.constant 0 : i32
    return %c0_i32, %c0_i32_0 : i32, i32
  }
  func.func @transform_5(%arg0: i32) -> (i32, i32) {
    %c0_i32 = arith.constant 0 : i32
    %c0_i32_0 = arith.constant 0 : i32
    return %arg0, %c0_i32 : i32, i32
  }
}

</mosaic_0001>

<bundles_post_ra>
// kernel: tpu_custom_call.1
= control target key start
LH: loop header
LB: loop body
LE: loop exit
PB: predicated region body
PF: predicated region fallthrough
CT: control target
= control target key end

     0   :  { %s307_s0 = inlined_call_operand.vmem [shape: f32[16,32], index: 0, kind: input, shape index: {}]   ;;  %s308_s1 = inlined_call_operand.vmem [shape: f32[32,128], index: 1, kind: input, shape index: {}]   ;;  %s309_s2 = inlined_call_operand.vmem [shape: f32[1,128], index: 2, kind: input, shape index: {}]   ;;  %s310_s3 = inlined_call_operand.vmem [shape: f32[128,32], index: 3, kind: input, shape index: {}]   ;;  %s311_s4 = inlined_call_operand.vmem [shape: f32[1,32], index: 4, kind: input, shape index: {}]   ;;  %s312_s5 = inlined_call_operand.hbm [shape: f32[16,32], index: 5, kind: output, shape index: {}]  }
   0x1   :  { %v26_v0 = vld [vmem:[%s308_s1 + $0x18] sm:$0xff]  ;;  %v25_v1 = vld [vmem:[%s308_s1 + $0x10] sm:$0xff]  ;;  %v24_v2 = vld [vmem:[%s308_s1 + $0x8] sm:$0xff] }
   0x2   :  { %50 = vmatpush.msra.mxu0 %v26_v0  ;;  %v94_v3 = vld [vmem:[%s310_s3 + $0x78] sm:$0xff]  ;;  %v93_v4 = vld [vmem:[%s310_s3 + $0x70] sm:$0xff]  ;;  %v23_v5 = vld [vmem:[%s308_s1] sm:$0xff] }
   0x3   :  { %99 = vmatpush.msra.mxu1 %v94_v3  ;;  %v92_v6 = vld [vmem:[%s310_s3 + $0x68] sm:$0xff]  ;;  %144 = vmatpush.msra.mxu2 %v94_v3 }
   0x4   :  { %51 = vmatpush.msra.mxu0 %v25_v1 }
   0x5   :  { %10 = vsyncpa [#allocation3], 0  ;;  %v21_v7 = vld [vmem:[%s307_s0] sm:$0xff]  ;;  %vm31_vm0 = vcmask 261120   ;;  %100 = vmatpush.msra.mxu1 %v93_v4  ;;  %145 = vmatpush.msra.mxu2 %v93_v4  ;;  %v22_v9 = vld [vmem:[%s307_s0 + $0x8] sm:$0xff]  ;;  %s195_s11 = smov [#allocation2]  }
   0x6   :  { %52 = vmatpush.msra.mxu0 %v24_v2  ;;  %v91_v8 = vld [vmem:[%s310_s3 + $0x60] sm:$0xff]  ;;  %v90_v10 = vld [vmem:[%s310_s3 + $0x58] sm:$0xff]  ;;  %v89_v11 = vld [vmem:[%s310_s3 + $0x50] sm:$0xff]  ;;  %s128_s12 = sshll.u32 %s195_s11, 4  ;;  %s130_s15 = sshll.u32 %s312_s5, 4  ;;  %s129_s12 = int_to_ptr.vmem [resolvable:$true] %s128_s12  ;;  %s131_s15 = int_to_ptr.hbm [resolvable:$true] %s130_s15 }
   0x7   :  { %101 = vmatpush.msra.mxu1 %v92_v6  ;;  %146 = vmatpush.msra.mxu2 %v92_v6  ;;  %v88_v12 = vld [vmem:[%s310_s3 + $0x48] sm:$0xff]  ;;  %v87_v13 = vld [vmem:[%s310_s3 + $0x40] sm:$0xff]  ;;  %v86_v14 = vld [vmem:[%s310_s3 + $0x38] sm:$0xff]  ;;  %s196_s16 = smov 128   ;;  %s197_s17 = smov 8  }
   0x8   :  { %53 = vmatpush.msra.mxu0 %v23_v5  ;;  %v85_v15 = vld [vmem:[%s310_s3 + $0x30] sm:$0xff]  ;;  %v84_v16 = vld [vmem:[%s310_s3 + $0x28] sm:$0xff]  ;;  %v83_v17 = vld [vmem:[%s310_s3 + $0x20] sm:$0xff] }
   0x9   :  { %142 = vmatmul.msk.f32.vlgmr.msra.gmra.mxu0 %vm31_vm0, %v21_v7  ;;  %102 = vmatpush.msra.mxu1 %v91_v8  ;;  %v82_v18 = vld [vmem:[%s310_s3 + $0x18] sm:$0xff]  ;;  %v81_v19 = vld [vmem:[%s310_s3 + $0x10] sm:$0xff]  ;;  %v80_v20 = vld [vmem:[%s310_s3 + $0x8] sm:$0xff] }
   0xa   :  { %147 = vmatpush.msra.mxu2 %v91_v8  ;;  %v79_v21 = vld [vmem:[%s310_s3] sm:$0xff] }
   0xb   :  { %103 = vmatpush.msra.mxu1 %v90_v10  ;;  %v163_v22 = vld [vmem:[%s309_s2] ss:$0 sm:$0xff] }
   0xc   :  { %148 = vmatpush.msra.mxu2 %v90_v10  ;;  %v164_v45 = vld [vmem:[%s311_s4] ss:$0 sm:$0xff] }
   0xd   :  { %104 = vmatpush.msra.mxu1 %v89_v11 }
   0xe   :  { %149 = vmatpush.msra.mxu2 %v89_v11 }
   0xf   :  { %105 = vmatpush.msra.mxu1 %v88_v12 }
  0x10   :  { %150 = vmatpush.msra.mxu2 %v88_v12 }
  0x11   :  { %143 = vmatmul.msk.f32.gmra.mxu0 %vm31_vm0, %v22_v9  ;;  %106 = vmatpush.msra.mxu1 %v87_v13 }
  0x12   :  { %151 = vmatpush.msra.mxu2 %v87_v13 }
  0x13   :  { %107 = vmatpush.msra.mxu1 %v86_v14 }
  0x14   :  { %152 = vmatpush.msra.mxu2 %v86_v14 }
  0x15   :  { %108 = vmatpush.msra.mxu1 %v85_v15 }
  0x16   :  { %153 = vmatpush.msra.mxu2 %v85_v15 }
  0x17   :  { %109 = vmatpush.msra.mxu1 %v84_v16 }
  0x18   :  { %154 = vmatpush.msra.mxu2 %v84_v16 }
  0x19   :  { %110 = vmatpush.msra.mxu1 %v83_v17 }
  0x1a   :  { %155 = vmatpush.msra.mxu2 %v83_v17 }
  0x1b   :  { %111 = vmatpush.msra.mxu1 %v82_v18 }
  0x1c   :  { %156 = vmatpush.msra.mxu2 %v82_v18 }
  0x1d   :  { %112 = vmatpush.msra.mxu1 %v81_v19 }
  0x1e   :  { %157 = vmatpush.msra.mxu2 %v81_v19 }
  0x1f   :  { %113 = vmatpush.msra.mxu1 %v80_v20 }
  0x20   :  { %158 = vmatpush.msra.mxu2 %v80_v20 }
  0x21   :  { %114 = vmatpush.msra.mxu1 %v79_v21 }
  0x22   :  { %159 = vmatpush.msra.mxu2 %v79_v21 }
  0x86   :  { %v55_v23 = vpop.f32.mrf.mxu0 }
  0x87   :  { %v56_v24 = vadd.f32 %v163_v22, %v55_v23 }
  0x89   :  { %v63_v25 = vmul.f32 0.044715, %v56_v24  ;;  %v61_v38 = vmul.f32 0.5, %v56_v24 }
  0x8b   :  { %v65_v26 = vmul.f32 %v63_v25, %v56_v24 }
  0x8d   :  { %v67_v27 = vmul.f32 %v65_v26, %v56_v24 }
  0x8e   :  { %v58_v28 = vpop.f32.mrf.mxu0 }
  0x8f   :  { %v59_v29 = vadd.f32 %v163_v22, %v58_v28  ;;  %v69_v30 = vadd.f32 %v67_v27, %v56_v24 }
  0x91   :  { %v71_v31 = vmul.f32 0.7978846, %v69_v30  ;;  %v64_v32 = vmul.f32 0.044715, %v59_v29  ;;  %v62_v42 = vmul.f32 0.5, %v59_v29 }
  0x93   :  { %165 = vtanh.f32 %v71_v31  ;;  %v66_v33 = vmul.f32 %v64_v32, %v59_v29 }
  0x95   :  { %v68_v34 = vmul.f32 %v66_v33, %v59_v29 }
  0x97   :  { %v70_v35 = vadd.f32 %v68_v34, %v59_v29 }
  0x99   :  { %v166_v36 = vpop.eup %165  ;;  %v72_v37 = vmul.f32 0.7978846, %v70_v35 }
  0x9a   :  { %v75_v39 = vadd.f32 1.0, %v166_v36 }
  0x9b   :  { %167 = vtanh.f32 %v72_v37 }
  0x9c   :  { %v77_v40 = vmul.f32 %v75_v39, %v61_v38 }
  0x9e   :  { %115 = vmatmul.f32.vlgmr.msra.gmra.mxu1 %v77_v40 }
  0xa1   :  { %v168_v41 = vpop.eup %167 }
  0xa2   :  { %v76_v43 = vadd.f32 1.0, %v168_v41 }
  0xa4   :  { %v78_v44 = vmul.f32 %v76_v43, %v62_v42 }
  0xa6   :  { %118 = vmatmul.f32.vlgmr.msra.gmra.mxu2 %v78_v44 }
 0x11b   :  { %v116_v46 = vpop.f32.mrf.mxu1 }
 0x11c   :  { %v117_v47 = vadd.f32 %v164_v45, %v116_v46 }
 0x11e   :  { %122 = vst.msk [vmem:[#allocation2] sm:$0xff] %vm31_vm0, %v117_v47 }
 0x129   :  { %v119_v48 = vpop.f32.mrf.mxu2 }
 0x12a   :  { %v120_v49 = vadd.f32 %v164_v45, %v119_v48 }
 0x12c   :  { %123 = vst.msk [vmem:[#allocation2 + $0x8] sm:$0xff] %vm31_vm0, %v120_v49 }
 0x12d   :  { %136 = dma.vmem_to_hbm [thread:$0]  %s129_s12, 256, %s131_s15, [#allocation3], %s196_s16, %s196_s16, %s197_s17  }
 0x12e   :  { %193 = dma.done.wait [#allocation3], 256  }
 0x12f   :  { %194 = vsyncadd [#allocation3], 4294967040 }
 0x130   :  { %141 = vsyncpa [#allocation3], 1 }

</bundles_post_ra>
